<compile_context>
chip_gen: v5e
topology: v5e:2x2
jax: 0.10.0
libtpu: 0.0.40
codegen_flags: <defaults>
</compile_context>

<pallas_src>
import functools

import jax
import jax.numpy as jnp
from jax.experimental import pallas as pl
from jax.experimental.pallas import tpu as pltpu


def _domain_classifier_kernel(x_ref, w1_ref, b1_ref, w2_ref, b2_ref, o_ref):
    """All refs are VMEM tiles.

    x_ref : (TN, Din)   (f32 or bf16)
    w1_ref: (Din, H)    b1_ref: (1, H)   (bias always f32)
    w2_ref: (H, D)      b2_ref: (1, D)
    o_ref : (TN, D)     (f32)
    """
    x = x_ref[...]

    # Linear 1 + ReLU : MXU matmul with f32 accumulation, VPU max.
    h = jnp.dot(x, w1_ref[...], preferred_element_type=jnp.float32) + b1_ref[...]
    h = jnp.maximum(h, 0.0)

    # Linear 2 : cast back to the matmul dtype so the bf16 path stays on the
    # bf16-native MXU (no-op in the f32 path).
    logits = (
        jnp.dot(h.astype(w2_ref.dtype), w2_ref[...], preferred_element_type=jnp.float32)
        + b2_ref[...]
    )

    # LogSoftmax over the domain axis — numerically stable log-sum-exp.
    m = jnp.max(logits, axis=-1, keepdims=True)
    e = jnp.exp(logits - m)                                   # EUP
    lse = m + jnp.log(jnp.sum(e, axis=-1, keepdims=True))
    o_ref[...] = (logits - lse).astype(o_ref.dtype)


def prepare_params(params):
    """One-time weight prep, hoisted out of the per-call path.

    PyTorch nn.Linear stores weights as (out, in); transpose once so the kernel
    does row-major x @ W. Biases reshaped to (1, width) rows for broadcasting.
    """
    return {
        "w1": params["w1"].T.astype(jnp.float32),              # (Din, H)
        "b1": params["b1"].reshape(1, -1).astype(jnp.float32),  # (1, H)
        "w2": params["w2"].T.astype(jnp.float32),              # (H, D)
        "b2": params["b2"].reshape(1, -1).astype(jnp.float32),  # (1, D)
    }


@functools.partial(jax.jit, static_argnames=("block_rows", "compute_dtype"))
def domain_classifier_forward(x, prepped, *, block_rows=512,
                              compute_dtype=jnp.float32):
    """x: (..., input_size)  ->  log-softmax scores (..., num_domains).

    grad_reverse is the identity in the forward pass; dropout is eval-mode
    identity.
    """
    # TODO(synk): training-mode Dropout(p) and the GradientReverse backward
    # (grad scaled by -lambd) are training-time constructs; this kernel
    # implements the eval-mode forward only.
    *lead, din = x.shape
    n = 1
    for d in lead:
        n *= d

    w1 = prepped["w1"].astype(compute_dtype)
    w2 = prepped["w2"].astype(compute_dtype)
    b1 = prepped["b1"]          # biases stay f32
    b2 = prepped["b2"]
    hidden = w1.shape[1]
    ndom = w2.shape[1]

    xr = x.reshape(n, din).astype(compute_dtype)

    # Row-tile size: multiple of 16 sublanes (covers f32 and bf16 packing),
    # capped by block_rows.  Per-step VMEM ≈ 2 buffers x TN x (Din + D) x dtype
    # + resident weights; with the defaults this stays far under the scoped
    # VMEM limits (16 MiB v5e, 32 MiB v6e/v7x).
    tn = max(16, min(block_rows, ((n + 15) // 16) * 16))
    tn = ((tn + 15) // 16) * 16
    n_pad = ((n + tn - 1) // tn) * tn
    if n_pad != n:
        xr = jnp.pad(xr, ((0, n_pad - n), (0, 0)))

    grid = (n_pad // tn,)

    out = pl.pallas_call(
        _domain_classifier_kernel,
        out_shape=jax.ShapeDtypeStruct((n_pad, ndom), jnp.float32),
        grid_spec=pltpu.PrefetchScalarGridSpec(
            num_scalar_prefetch=0,
            grid=grid,
            in_specs=[
                pl.BlockSpec((tn, din), lambda i: (i, 0)),        # x tile (streamed)
                pl.BlockSpec((din, hidden), lambda i: (0, 0)),    # W1 (resident)
                pl.BlockSpec((1, hidden), lambda i: (0, 0)),      # b1 (resident)
                pl.BlockSpec((hidden, ndom), lambda i: (0, 0)),   # W2 (resident)
                pl.BlockSpec((1, ndom), lambda i: (0, 0)),        # b2 (resident)
            ],
            out_specs=pl.BlockSpec((tn, ndom), lambda i: (i, 0)),
        ),
        compiler_params=pltpu.CompilerParams(
            dimension_semantics=("parallel",),
        ),
    )(xr, w1, b1, w2, b2)

    out = out[:n]
    return out.reshape(*lead, ndom)


def _reference(x, params):
    """Pure-JAX reference mirroring the PyTorch forward (eval mode)."""
    h = jnp.maximum(x @ params["w1"].T + params["b1"], 0.0)
    logits = h @ params["w2"].T + params["b2"]
    return jax.nn.log_softmax(logits, axis=-1)


if __name__ == "__main__":
    # Small shapes consistent with the module.
    input_size, hidden_size, num_domains = 32, 64, 4
    dropout, lambd = 0.1, 1.0      # dropout: eval-mode identity; lambd: backward-only
    seq_len, batch_size = 32, 8    # N = 256 rows

    key = jax.random.PRNGKey(0)
    kx, k1, k2, k3, k4 = jax.random.split(key, 5)
    x = jax.random.normal(kx, (seq_len, batch_size, input_size), jnp.float32)

    # nn.Linear default init: U(-1/sqrt(fan_in), +1/sqrt(fan_in)), deterministic.
    lim1 = 1.0 / (input_size ** 0.5)
    lim2 = 1.0 / (hidden_size ** 0.5)
    params = {
        "w1": jax.random.uniform(k1, (hidden_size, input_size), jnp.float32, -lim1, lim1),
        "b1": jax.random.uniform(k2, (hidden_size,), jnp.float32, -lim1, lim1),
        "w2": jax.random.uniform(k3, (num_domains, hidden_size), jnp.float32, -lim2, lim2),
        "b2": jax.random.uniform(k4, (num_domains,), jnp.float32, -lim2, lim2),
    }
    prepped = prepare_params(params)   # hoisted weight prep (done once)

    # f32 path — exact against the reference.
    scores = domain_classifier_forward(x, prepped, block_rows=128)
    jax.block_until_ready(scores)

    ref = _reference(x, params)
    assert scores.shape == (seq_len, batch_size, num_domains)
    assert jnp.allclose(scores, ref, atol=1e-5, rtol=1e-5)
    # log-softmax rows must exp-sum to 1
    assert jnp.allclose(jnp.sum(jnp.exp(scores), axis=-1), 1.0, atol=1e-5)

    # bf16 MXU path (v6e/v7x feedback): bf16 operands, f32 accumulation.
    scores_bf16 = domain_classifier_forward(
        x, prepped, block_rows=128, compute_dtype=jnp.bfloat16)
    jax.block_until_ready(scores_bf16)
    assert jnp.allclose(scores_bf16, ref, atol=5e-2, rtol=5e-2)

    print("KERNEL_OK")
</pallas_src>

<mosaic_0001>
module attributes {stable_mosaic.version = 11 : i64} {
  func.func @_domain_classifier_kernel(%arg0: i32, %arg1: memref<128x32xf32, #tpu.memory_space<vmem>>, %arg2: memref<32x64xf32, #tpu.memory_space<vmem>>, %arg3: memref<1x64xf32, #tpu.memory_space<vmem>>, %arg4: memref<64x4xf32, #tpu.memory_space<vmem>>, %arg5: memref<1x4xf32, #tpu.memory_space<vmem>>, %arg6: memref<128x4xf32, #tpu.memory_space<vmem>>) attributes {dimension_semantics = [#tpu.dimension_semantics<parallel>], iteration_bounds = array<i64: 2>, scalar_prefetch = 0 : i64, scratch_operands = 0 : i64, tpu.core_type = #tpu.core_type<tc>, window_params = [{transform_indices = @transform_0, window_bounds = array<i64: 128, 32>}, {pipeline_mode = #tpu.pipeline_mode<synchronous>, transform_indices = @transform_1, window_bounds = array<i64: 32, 64>}, {pipeline_mode = #tpu.pipeline_mode<synchronous>, transform_indices = @transform_2, window_bounds = array<i64: 1, 64>}, {pipeline_mode = #tpu.pipeline_mode<synchronous>, transform_indices = @transform_3, window_bounds = array<i64: 64, 4>}, {pipeline_mode = #tpu.pipeline_mode<synchronous>, transform_indices = @transform_4, window_bounds = array<i64: 1, 4>}, {transform_indices = @transform_5, window_bounds = array<i64: 128, 4>}]} {
    %c0 = arith.constant 0 : index
    %c0_0 = arith.constant 0 : index
    %0 = vector.load %arg1[%c0, %c0_0] : memref<128x32xf32, #tpu.memory_space<vmem>>, vector<128x32xf32>
    %c0_1 = arith.constant 0 : index
    %c0_2 = arith.constant 0 : index
    %1 = vector.load %arg2[%c0_1, %c0_2] : memref<32x64xf32, #tpu.memory_space<vmem>>, vector<32x64xf32>
    %cst = arith.constant dense<0.000000e+00> : vector<128x64xf32>
    %2 = tpu.matmul %0, %1, %cst {dimension_numbers = #tpu.dot_dimension_numbers<[1], [0], [0], [1], [0, 0, 1, 1], [], []>} : vector<128x32xf32>, vector<32x64xf32>, vector<128x64xf32> -> vector<128x64xf32>
    %c0_3 = arith.constant 0 : index
    %c0_4 = arith.constant 0 : index
    %3 = vector.load %arg3[%c0_3, %c0_4] : memref<1x64xf32, #tpu.memory_space<vmem>>, vector<1x64xf32>
    %4 = vector.broadcast %3 : vector<1x64xf32> to vector<128x64xf32>
    %5 = arith.addf %2, %4 : vector<128x64xf32>
    %cst_5 = arith.constant 0.000000e+00 : f32
    %6 = vector.broadcast %cst_5 : f32 to vector<128x64xf32>
    %7 = arith.maximumf %5, %6 : vector<128x64xf32>
    %c0_6 = arith.constant 0 : index
    %c0_7 = arith.constant 0 : index
    %8 = vector.load %arg4[%c0_6, %c0_7] : memref<64x4xf32, #tpu.memory_space<vmem>>, vector<64x4xf32>
    %cst_8 = arith.constant dense<0.000000e+00> : vector<128x4xf32>
    %9 = tpu.matmul %7, %8, %cst_8 {dimension_numbers = #tpu.dot_dimension_numbers<[1], [0], [0], [1], [0, 0, 1, 1], [], []>} : vector<128x64xf32>, vector<64x4xf32>, vector<128x4xf32> -> vector<128x4xf32>
    %c0_9 = arith.constant 0 : index
    %c0_10 = arith.constant 0 : index
    %10 = vector.load %arg5[%c0_9, %c0_10] : memref<1x4xf32, #tpu.memory_space<vmem>>, vector<1x4xf32>
    %11 = vector.broadcast %10 : vector<1x4xf32> to vector<128x4xf32>
    %12 = arith.addf %9, %11 : vector<128x4xf32>
    %cst_11 = arith.constant dense<0xFF800000> : vector<128xf32>
    %13 = vector.multi_reduction <maximumf>, %12, %cst_11 [1] : vector<128x4xf32> to vector<128xf32>
    %14 = vector.shape_cast %13 : vector<128xf32> to vector<128x1xf32>
    %15 = vector.broadcast %14 : vector<128x1xf32> to vector<128x4xf32>
    %16 = arith.subf %12, %15 : vector<128x4xf32>
    %17 = math.exp %16 : vector<128x4xf32>
    %cst_12 = arith.constant dense<0.000000e+00> : vector<128xf32>
    %18 = vector.multi_reduction <add>, %17, %cst_12 [1] : vector<128x4xf32> to vector<128xf32>
    %19 = vector.shape_cast %18 : vector<128xf32> to vector<128x1xf32>
    %20 = math.log %19 : vector<128x1xf32>
    %21 = arith.addf %14, %20 : vector<128x1xf32>
    %22 = vector.broadcast %21 : vector<128x1xf32> to vector<128x4xf32>
    %23 = arith.subf %12, %22 : vector<128x4xf32>
    %c0_13 = arith.constant 0 : index
    %c0_14 = arith.constant 0 : index
    %24 = vector.load %arg6[%c0_13, %c0_14] : memref<128x4xf32, #tpu.memory_space<vmem>>, vector<128x4xf32>
    tpu.vector_store %arg6[%c0_13, %c0_14], %23 {strides = array<i32>} : memref<128x4xf32, #tpu.memory_space<vmem>>, vector<128x4xf32>,
    return
  }
  func.func @transform_0(%arg0: i32) -> (i32, i32) {
    %c0_i32 = arith.constant 0 : i32
    %c0_i32_0 = arith.constant 0 : i32
    return %arg0, %c0_i32 : i32, i32
  }
  func.func @transform_1(%arg0: i32) -> (i32, i32) {
    %c0_i32 = arith.constant 0 : i32
    %c0_i32_0 = arith.constant 0 : i32
    %c0_i32_1 = arith.constant 0 : i32
    return %c0_i32, %c0_i32_0 : i32, i32
  }
  func.func @transform_2(%arg0: i32) -> (i32, i32) {
    %c0_i32 = arith.constant 0 : i32
    %c0_i32_0 = arith.constant 0 : i32
    %c0_i32_1 = arith.constant 0 : i32
    return %c0_i32, %c0_i32_0 : i32, i32
  }
  func.func @transform_3(%arg0: i32) -> (i32, i32) {
    %c0_i32 = arith.constant 0 : i32
    %c0_i32_0 = arith.constant 0 : i32
    %c0_i32_1 = arith.constant 0 : i32
    return %c0_i32, %c0_i32_0 : i32, i32
  }
  func.func @transform_4(%arg0: i32) -> (i32, i32) {
    %c0_i32 = arith.constant 0 : i32
    %c0_i32_0 = arith.constant 0 : i32
    %c0_i32_1 = arith.constant 0 : i32
    return %c0_i32, %c0_i32_0 : i32, i32
  }
  func.func @transform_5(%arg0: i32) -> (i32, i32) {
    %c0_i32 = arith.constant 0 : i32
    %c0_i32_0 = arith.constant 0 : i32
    return %arg0, %c0_i32 : i32, i32
  }
}

</mosaic_0001>

<bundles_post_ra>
// kernel: domain_classifier_forward.1
= control target key start
LH: loop header
LB: loop body
LE: loop exit
PB: predicated region body
PF: predicated region fallthrough
CT: control target
= control target key end

     0   :  { %10 = vsyncpa [#allocation3], 0  ;;  %s1513_s0 = inlined_call_operand.hbm [shape: f32[256,32], index: 0, kind: input, shape index: {}]   ;;  %s1514_s1 = inlined_call_operand.vmem [shape: f32[32,64], index: 1, kind: input, shape index: {}]   ;;  %s1515_s2 = inlined_call_operand.vmem [shape: f32[1,64], index: 2, kind: input, shape index: {}]   ;;  %s1516_s3 = inlined_call_operand.vmem [shape: f32[64,4], index: 3, kind: input, shape index: {}]   ;;  %s1517_s4 = inlined_call_operand.vmem [shape: f32[1,4], index: 4, kind: input, shape index: {}]   ;;  %s1518_s5 = inlined_call_operand.vmem [shape: f32[256,4], index: 5, kind: output, shape index: {}]  }
   0x1   :  { %12 = vsyncpa [#allocation3 + $0x1], 0  ;;  %s1084_s18 = smov 0   ;;  %s1086_s19 = smov 0  }
   0x2   :  { %s1088_s20 = smov 0   ;;  %s1090_s21 = smov 0  }
   0x3 LB: > { %s821_s22 = sadd.s32 4294967295, %s1050_s21   ;;  %s1104_s23 = sadd.s32 1, %s1050_s21   ;;  %s1050_s21 = sphi %s1090_s21, %s1525_s21   ;;  %s1046_s20 = sphi %s1088_s20, %s1524_s20   ;;  %s1042_s19 = sphi %s1086_s19, %s1523_s19   ;;  %s1038_s18 = sphi %s1084_s18, %s1522_s18  }
   0x4   : > { %s22_s24 = ssub.s32 %s1050_s21, %s1104_s23  ;;  %s25_s25 = sadd.s32 1, %s1046_s20 }
   0x5   : > { %p23_p0 = scmp.eq.s32.totalorder %s22_s24, 0  ;;  %p32_p1 = scmp.ne.s32.totalorder %s1046_s20, %s1042_s19 }
   0x6   : > { %p33_p2 = scmp.eq.s32.totalorder %s1050_s21, 0  ;;  %p38_p3 = scmp.ne.s32.totalorder %s1042_s19, %s1038_s18 }
   0x7   : > { %s1114_s26 = scalar_select %p23_p0, %s1046_s20, %s25_s25  }
   0x8   : > { %p1116_p4 = por %p33_p2, %p32_p1  ;;  %p39_p5 = scmp.eq.s32.totalorder %s821_s22, 0 }
   0x9   : > { %p885_p6 = scmp.lt.s32.totalorder %s1050_s21, 2  ;;  %s184_s29 = sand.u32 1, %s1046_s20  }
   0xa   : > { %p1123_p7 = por %p39_p5, %p38_p3  ;;  %s825_s30 = sshll.u32 %s184_s29, 7 }
   0xb   : > { %s866_s6 = sshll.u32 %s1050_s21, 7  ;;  %s188_s10 = scalar_lea.vmem [#allocation2], %s825_s30 }
   0xc   : > { %s193_s9 = scalar_lea.hbm %s1513_s0, %s866_s6  ;;  %s196_s11 = sshll.u32 %s188_s10, 4  ;;  %s197_s11 = int_to_ptr.vmem [resolvable:$true] %s196_s11 }
   0xd   : > { %s194_s12 = sshll.u32 %s193_s9, 4  ;;  %p1134_p8 = pnand %p885_p6, %p1116_p4  ;;  %s195_s12 = int_to_ptr.hbm [resolvable:$true] %s194_s12 }
   0xe   : > { %p828_p9 = scmp.ge.s32.totalorder %s1050_s21, 1  ;;  %s185_s14 = scalar_lea.sflag [#allocation3], %s184_s29 }
   0xf   : > { %s986_s15 = sshra.s32 %s195_s12, 4  ;;  %p990_p11 = pneg %p1134_p8  ;;  %s987_s15 = int_to_ptr.hbm [resolvable:$true] %s986_s15 }
  0x10   : > { %s988_s16 = scalar_lea.hbm %s987_s15, 128  ;;  %s993_s24 = scalar_lea.hbm %s1513_s0, 256 }
  0x11   : > { %p989_p10 = scmp.ne.s32.totalorder %s987_s15, %s988_s16  ;;  %p994_p0 = scmp.lt.s32.totalorder %s987_s15, %s1513_s0 }
  0x12   : > { %p995_p1 = scmp.lt.s32.totalorder %s993_s24, %s988_s16 }
  0x13   : > { %p991_p12 = pnand %p990_p11, %p989_p10 }
  0x14   : > { %p996_p2 = por %p995_p1, %p994_p0 }
  0x15   : > { %p992_p13 = pneg %p991_p12 }
  0x17   : > { %p997_p3 = pnand %p996_p2, %p992_p13 }
  0x19   : > { %1000 = shalt.err (!%p997_p3)
}
  0x1a   : > { %s1052_s29 = smov 128   ;;  %s1053_s30 = smov 8  }
  0x1b   : > { %884 = dma.hbm_to_vmem [thread:$0]  (!%p1134_p8), %s195_s12, 2048, %s197_s11, %s185_s14, %s1052_s29, %s1052_s29, %s1053_s30  }
  0x1c   : > { %p204_p4 = scmp.lt.s32.totalorder %s1050_s21, 3 }
  0x1e   : > { %p205_p5 = pnand %p828_p9, %p204_p4 }
  0x1f   : > { %s210_s6 = sand.u32 (!%p205_p5), 1, %s1042_s19  }
  0x20   : > { %208 = sbr.rel (%p205_p5) target bundleno = 689 (0x2b1), region = 40  ;;  %s829_s7 = sshll.u32 (!%p205_p5), %s210_s6, 7 }
  0x21   : > { %s211_s8 = scalar_lea.sflag (!%p205_p5), [#allocation3], %s210_s6  ;;  %s1153_s9 = scalar_lea.vmem (!%p205_p5), [#allocation2], %s829_s7 }
  0x25   : > { %1033 = dma.done.wait (%p1123_p7), %s211_s8, 2048  }
  0x26   : > { %1035 = vsyncadd (%p1123_p7), %s211_s8, 4294965248  ;;  %v268_v0 = vld [vmem:[%s1514_s1 + $0x18] sm:$0xff]  ;;  %v267_v1 = vld [vmem:[%s1514_s1 + $0x10] sm:$0xff]  ;;  %vm273_vm0 = vcmask 261120   ;;  %vm415_vm1 = vcmask 523264   ;;  %vm529_vm2 = vcmask 31744  }
  0x27   : > { %334 = vmatpush.msra.mxu0 %v268_v0  ;;  %867 = vmatpush.msra.mxu3 %v268_v0  ;;  %v266_v2 = vld [vmem:[%s1514_s1 + $0x8] sm:$0xff]  ;;  %v265_v3 = vld [vmem:[%s1514_s1] sm:$0xff]  ;;  %v251_v6 = vld [vmem:[%s1153_s9 + $0x10] sm:$0xff]  ;;  %s830_s18 = sshll.u32 %s821_s22, 4 }
  0x28   : > { %v249_v4 = vld [vmem:[%s1153_s9] sm:$0xff]  ;;  %v250_v5 = vld [vmem:[%s1153_s9 + $0x8] sm:$0xff]  ;;  %v252_v7 = vld [vmem:[%s1153_s9 + $0x18] sm:$0xff]  ;;  %p244_p6 = scmp.lt.s32.totalorder %s830_s18, 31 }
  0x29   : > { %335 = vmatpush.msra.mxu0 %v267_v1  ;;  %868 = vmatpush.msra.mxu3 %v267_v1  ;;  %v253_v8 = vld [vmem:[%s1153_s9 + $0x20] sm:$0xff]  ;;  %v258_v9 = vld [vmem:[%s1153_s9 + $0x48] sm:$0xff]  ;;  %v259_v11 = vld [vmem:[%s1153_s9 + $0x50] sm:$0xff] }
  0x2a   : > { %v254_v10 = vld [vmem:[%s1153_s9 + $0x28] sm:$0xff]  ;;  %v255_v12 = vld [vmem:[%s1153_s9 + $0x30] sm:$0xff]  ;;  %v260_v13 = vld [vmem:[%s1153_s9 + $0x58] sm:$0xff]  ;;  %s1527_s18 = smov (!%p244_p6, %s830_s18), 31 }
  0x2b   : > { %336 = vmatpush.msra.mxu0 %v266_v2  ;;  %869 = vmatpush.msra.mxu3 %v266_v2  ;;  %v410_v14 = vld [vmem:[%s1516_s3 + $0x38] sm:$0xff]  ;;  %v409_v15 = vld [vmem:[%s1516_s3 + $0x30] sm:$0xff]  ;;  %v408_v16 = vld [vmem:[%s1516_s3 + $0x28] sm:$0xff]  ;;  %s831_s24 = sshll.u32 %s1527_s18, 3 }
  0x2c   : > { %472 = vmatpush.msra.mxu1 %v410_v14  ;;  %871 = vmatpush.msra.mxu2 %v410_v14  ;;  %v256_v17 = vld [vmem:[%s1153_s9 + $0x38] sm:$0xff]  ;;  %v407_v18 = vld [vmem:[%s1516_s3 + $0x20] sm:$0xff]  ;;  %v262_v22 = vld [vmem:[%s1153_s9 + $0x68] sm:$0xff]  ;;  %s1435_s25 = scalar_lea.vmem %s1518_s5, %s831_s24 }
  0x2d   : > { %337 = vmatpush.msra.mxu0 %v265_v3  ;;  %870 = vmatpush.msra.mxu3 %v265_v3  ;;  %v261_v19 = vld [vmem:[%s1153_s9 + $0x60] sm:$0xff]  ;;  %v406_v20 = vld [vmem:[%s1516_s3 + $0x18] sm:$0xff]  ;;  %v263_v23 = vld [vmem:[%s1153_s9 + $0x70] sm:$0xff] }
  0x2e   : > { %832 = vmatmul.msk.f32.vlgmr.msra.gmra.mxu0 %vm273_vm0, %v249_v4  ;;  %841 = vmatmul.msk.f32.vlgmr.msra.gmra.mxu3 %vm273_vm0, %v258_v9  ;;  %v257_v21 = vld [vmem:[%s1153_s9 + $0x40] sm:$0xff]  ;;  %v264_v24 = vld [vmem:[%s1153_s9 + $0x78] sm:$0xff]  ;;  %v405_v25 = vld [vmem:[%s1516_s3 + $0x10] sm:$0xff] }
  0x2f   : > { %473 = vmatpush.msra.mxu1 %v409_v15  ;;  %872 = vmatpush.msra.mxu2 %v409_v15  ;;  %v404_v26 = vld [vmem:[%s1516_s3 + $0x8] sm:$0xff]  ;;  %v403_v27 = vld [vmem:[%s1516_s3] sm:$0xff] }
  0x30   : > { %v1230_v28 = vld [vmem:[%s1515_s2] ss:$0 sm:$0xff] }
  0x31   : > { %474 = vmatpush.msra.mxu1 %v408_v16  ;;  %873 = vmatpush.msra.mxu2 %v408_v16 }
  0x33   : > { %475 = vmatpush.msra.mxu1 %v407_v18  ;;  %874 = vmatpush.msra.mxu2 %v407_v18 }
  0x35   : > { %476 = vmatpush.msra.mxu1 %v406_v20  ;;  %875 = vmatpush.msra.mxu2 %v406_v20 }
  0x36   : > { %833 = vmatmul.msk.f32.gmra.mxu0 %vm273_vm0, %v250_v5  ;;  %842 = vmatmul.msk.f32.gmra.mxu3 %vm273_vm0, %v259_v11 }
  0x37   : > { %477 = vmatpush.msra.mxu1 %v405_v25  ;;  %876 = vmatpush.msra.mxu2 %v405_v25 }
  0x39   : > { %478 = vmatpush.msra.mxu1 %v404_v26  ;;  %877 = vmatpush.msra.mxu2 %v404_v26 }
  0x3b   : > { %479 = vmatpush.msra.mxu1 %v403_v27  ;;  %878 = vmatpush.msra.mxu2 %v403_v27 }
  0x3e   : > { %834 = vmatmul.msk.f32.gmra.mxu0 %vm273_vm0, %v251_v6  ;;  %843 = vmatmul.msk.f32.gmra.mxu3 %vm273_vm0, %v260_v13  ;;  %v1267_v13 = vld [vmem:[%s1517_s4] ss:$0 sm:$0xff] }
  0x46   : > { %835 = vmatmul.msk.f32.gmra.mxu0 %vm273_vm0, %v252_v7  ;;  %844 = vmatmul.msk.f32.gmra.mxu3 %vm273_vm0, %v261_v19 }
  0x4e   : > { %836 = vmatmul.msk.f32.gmra.mxu0 %vm273_vm0, %v253_v8  ;;  %845 = vmatmul.msk.f32.gmra.mxu3 %vm273_vm0, %v262_v22 }
  0x56   : > { %837 = vmatmul.msk.f32.gmra.mxu0 %vm273_vm0, %v254_v10  ;;  %846 = vmatmul.msk.f32.gmra.mxu3 %vm273_vm0, %v263_v23 }
  0x5e   : > { %838 = vmatmul.msk.f32.gmra.mxu0 %vm273_vm0, %v255_v12  ;;  %847 = vmatmul.msk.f32.gmra.mxu3 %vm273_vm0, %v264_v24 }
  0x66   : > { %839 = vmatmul.msk.f32.gmra.mxu0 %vm273_vm0, %v256_v17 }
  0x6e   : > { %840 = vmatmul.msk.f32.gmra.mxu0 %vm273_vm0, %v257_v21 }
  0xab   : > { %v339_v29 = vpop.f32.mrf.mxu0 }
  0xac   : > { %v340_v30 = vadd.f32 %v1230_v28, %v339_v29 }
  0xae   : > { %v387_v31 = vmax.f32 %v340_v30, 0.0 }
  0xb0   : > { %848 = vmatmul.msk.f32.vlgmr.msra.gmra.mxu1 %vm415_vm1, %v387_v31 }
  0xb1   : > { %v366_v50 = vpop.f32.mrf.mxu3 }
  0xb2   : > { %v367_v58 = vadd.f32 %v1230_v28, %v366_v50 }
  0xb3   : > { %v342_v32 = vpop.f32.mrf.mxu0 }
  0xb4   : > { %v343_v33 = vadd.f32 %v1230_v28, %v342_v32  ;;  %v396_v59 = vmax.f32 %v367_v58, 0.0 }
  0xb6   : > { %v388_v34 = vmax.f32 %v343_v33, 0.0 }
  0xb8   : > { %849 = vmatmul.msk.f32.gmra.mxu1 %vm415_vm1, %v388_v34 }
  0xb9   : > { %v369_v55 = vpop.f32.mrf.mxu3 }
  0xba   : > { %v370_v61 = vadd.f32 %v1230_v28, %v369_v55 }
  0xbb   : > { %v345_v35 = vpop.f32.mrf.mxu0 }
  0xbc   : > { %v346_v36 = vadd.f32 %v1230_v28, %v345_v35  ;;  %v397_v62 = vmax.f32 %v370_v61, 0.0 }
  0xbe   : > { %v389_v37 = vmax.f32 %v346_v36, 0.0 }
  0xc0   : > { %850 = vmatmul.msk.f32.gmra.mxu1 %vm415_vm1, %v389_v37 }
  0xc1   : > { %v372_v60 = vpop.f32.mrf.mxu3 }
  0xc2   : > { %v373_v0 = vadd.f32 %v1230_v28, %v372_v60 }
  0xc3   : > { %v348_v38 = vpop.f32.mrf.mxu0 }
  0xc4   : > { %v349_v39 = vadd.f32 %v1230_v28, %v348_v38  ;;  %v398_v1 = vmax.f32 %v373_v0, 0.0 }
  0xc6   : > { %v390_v40 = vmax.f32 %v349_v39, 0.0 }
  0xc8   : > { %851 = vmatmul.msk.f32.gmra.mxu1 %vm415_vm1, %v390_v40 }
  0xc9   : > { %v375_v63 = vpop.f32.mrf.mxu3 }
  0xca   : > { %v376_v2 = vadd.f32 %v1230_v28, %v375_v63 }
  0xcb   : > { %v351_v41 = vpop.f32.mrf.mxu0 }
  0xcc   : > { %v352_v42 = vadd.f32 %v1230_v28, %v351_v41  ;;  %v399_v4 = vmax.f32 %v376_v2, 0.0 }
  0xce   : > { %v391_v43 = vmax.f32 %v352_v42, 0.0 }
  0xd0   : > { %852 = vmatmul.msk.f32.gmra.mxu1 %vm415_vm1, %v391_v43 }
  0xd1   : > { %v378_v3 = vpop.f32.mrf.mxu3 }
  0xd2   : > { %v379_v5 = vadd.f32 %v1230_v28, %v378_v3 }
  0xd3   : > { %v354_v44 = vpop.f32.mrf.mxu0 }
  0xd4   : > { %v355_v45 = vadd.f32 %v1230_v28, %v354_v44  ;;  %v400_v7 = vmax.f32 %v379_v5, 0.0 }
  0xd6   : > { %v392_v46 = vmax.f32 %v355_v45, 0.0 }
  0xd8   : > { %853 = vmatmul.msk.f32.gmra.mxu1 %vm415_vm1, %v392_v46 }
  0xd9   : > { %v381_v6 = vpop.f32.mrf.mxu3 }
  0xda   : > { %v382_v8 = vadd.f32 %v1230_v28, %v381_v6 }
  0xdb   : > { %v357_v47 = vpop.f32.mrf.mxu0 }
  0xdc   : > { %v358_v48 = vadd.f32 %v1230_v28, %v357_v47  ;;  %v401_v9 = vmax.f32 %v382_v8, 0.0 }
  0xde   : > { %v393_v49 = vmax.f32 %v358_v48, 0.0 }
  0xe0   : > { %854 = vmatmul.msk.f32.gmra.mxu1 %vm415_vm1, %v393_v49 }
  0xe1   : > { %v384_v10 = vpop.f32.mrf.mxu3 }
  0xe2   : > { %v385_v11 = vadd.f32 %v1230_v28, %v384_v10 }
  0xe3   : > { %v360_v51 = vpop.f32.mrf.mxu0 }
  0xe4   : > { %v361_v52 = vadd.f32 %v1230_v28, %v360_v51  ;;  %v402_v12 = vmax.f32 %v385_v11, 0.0 }
  0xe6   : > { %v394_v53 = vmax.f32 %v361_v52, 0.0 }
  0xe8   : > { %855 = vmatmul.msk.f32.gmra.mxu1 %vm415_vm1, %v394_v53 }
  0xeb   : > { %v363_v54 = vpop.f32.mrf.mxu0 }
  0xec   : > { %v364_v56 = vadd.f32 %v1230_v28, %v363_v54 }
  0xee   : > { %v395_v57 = vmax.f32 %v364_v56, 0.0 }
  0xf0   : > { %856 = vmatmul.msk.f32.vlgmr.msra.gmra.mxu2 %vm415_vm1, %v395_v57 }
  0xf8   : > { %857 = vmatmul.msk.f32.gmra.mxu2 %vm415_vm1, %v396_v59 }
 0x100   : > { %858 = vmatmul.msk.f32.gmra.mxu2 %vm415_vm1, %v397_v62 }
 0x108   : > { %859 = vmatmul.msk.f32.gmra.mxu2 %vm415_vm1, %v398_v1 }
 0x110   : > { %860 = vmatmul.msk.f32.gmra.mxu2 %vm415_vm1, %v399_v4 }
 0x118   : > { %861 = vmatmul.msk.f32.gmra.mxu2 %vm415_vm1, %v400_v7 }
 0x120   : > { %862 = vmatmul.msk.f32.gmra.mxu2 %vm415_vm1, %v401_v9 }
 0x128   : > { %863 = vmatmul.msk.f32.gmra.mxu2 %vm415_vm1, %v402_v12 }
 0x12d   : > { %v481_v14 = vpop.f32.mrf.mxu1 }
 0x12e   : > { %v1270_v15 = vadd.f32 %v1267_v13, %v481_v14 }
 0x130   : > { %v530_v16 = vsel %vm529_vm2, %v1270_v15, -inf }
 0x131   : > { %531 = vmax.xlane.f32.xlu0 %v530_v16 }
 0x135   : > { %v484_v17 = vpop.f32.mrf.mxu1 }
 0x136   : > { %v1275_v18 = vadd.f32 %v1267_v13, %v484_v17 }
 0x138   : > { %v533_v19 = vsel %vm529_vm2, %v1275_v18, -inf }
 0x139   : > { %534 = vmax.xlane.f32.xlu0 %v533_v19 }
 0x13d   : > { %v487_v20 = vpop.f32.mrf.mxu1 }
 0x13e   : > { %v1280_v21 = vadd.f32 %v1267_v13, %v487_v20 }
 0x140   : > { %v536_v22 = vsel %vm529_vm2, %v1280_v21, -inf }
 0x141   : > { %537 = vmax.xlane.f32.xlu1 %v536_v22 }
 0x145   : > { %v490_v23 = vpop.f32.mrf.mxu1 }
 0x146   : > { %v1285_v24 = vadd.f32 %v1267_v13, %v490_v23 }
 0x148   : > { %v539_v25 = vsel %vm529_vm2, %v1285_v24, -inf }
 0x149   : > { %540 = vmax.xlane.f32.xlu1 %v539_v25 }
 0x14d   : > { %v493_v26 = vpop.f32.mrf.mxu1 }
 0x14e   : > { %v1290_v27 = vadd.f32 %v1267_v13, %v493_v26 }
 0x150   : > { %v542_v28 = vsel %vm529_vm2, %v1290_v27, -inf }
 0x151   : > { %543 = vmax.xlane.f32.xlu2 %v542_v28 }
 0x155   : > { %v496_v29 = vpop.f32.mrf.mxu1 }
 0x156   : > { %v1295_v30 = vadd.f32 %v1267_v13, %v496_v29 }
 0x158   : > { %v545_v31 = vsel %vm529_vm2, %v1295_v30, -inf }
 0x159   : > { %546 = vmax.xlane.f32.xlu2 %v545_v31 }
 0x15d   : > { %v499_v32 = vpop.f32.mrf.mxu1 }
 0x15e   : > { %v1300_v33 = vadd.f32 %v1267_v13, %v499_v32 }
 0x160   : > { %v548_v34 = vsel %vm529_vm2, %v1300_v33, -inf }
 0x161   : > { %549 = vmax.xlane.f32.xlu0 %v548_v34 }
 0x165   : > { %v502_v35 = vpop.f32.mrf.mxu1 }
 0x166   : > { %v1305_v36 = vadd.f32 %v1267_v13, %v502_v35 }
 0x168   : > { %v551_v37 = vsel %vm529_vm2, %v1305_v36, -inf }
 0x169   : > { %552 = vmax.xlane.f32.xlu1 %v551_v37 }
 0x173   : > { %v505_v38 = vpop.f32.mrf.mxu2 }
 0x174   : > { %v1310_v39 = vadd.f32 %v1267_v13, %v505_v38 }
 0x176   : > { %v554_v40 = vsel %vm529_vm2, %v1310_v39, -inf }
 0x177   : > { %555 = vmax.xlane.f32.xlu2 %v554_v40 }
 0x17b   : > { %v508_v41 = vpop.f32.mrf.mxu2 }
 0x17c   : > { %v1315_v42 = vadd.f32 %v1267_v13, %v508_v41 }
 0x17e   : > { %v557_v43 = vsel %vm529_vm2, %v1315_v42, -inf }
 0x17f   : > { %558 = vmax.xlane.f32.xlu0 %v557_v43 }
 0x183   : > { %v511_v44 = vpop.f32.mrf.mxu2 }
 0x184   : > { %v1320_v45 = vadd.f32 %v1267_v13, %v511_v44 }
 0x186   : > { %v560_v46 = vsel %vm529_vm2, %v1320_v45, -inf }
 0x187   : > { %561 = vmax.xlane.f32.xlu1 %v560_v46 }
 0x18b   : > { %v514_v47 = vpop.f32.mrf.mxu2 }
 0x18c   : > { %v1325_v48 = vadd.f32 %v1267_v13, %v514_v47 }
 0x18e   : > { %v563_v49 = vsel %vm529_vm2, %v1325_v48, -inf }
 0x18f   : > { %564 = vmax.xlane.f32.xlu2 %v563_v49 }
 0x193   : > { %v517_v50 = vpop.f32.mrf.mxu2 }
 0x194   : > { %v1330_v51 = vadd.f32 %v1267_v13, %v517_v50 }
 0x196   : > { %v566_v52 = vsel %vm529_vm2, %v1330_v51, -inf }
 0x197   : > { %567 = vmax.xlane.f32.xlu0 %v566_v52 }
 0x19b   : > { %v520_v53 = vpop.f32.mrf.mxu2 }
 0x19c   : > { %v1335_v54 = vadd.f32 %v1267_v13, %v520_v53 }
 0x19e   : > { %v569_v55 = vsel %vm529_vm2, %v1335_v54, -inf }
 0x19f   : > { %570 = vmax.xlane.f32.xlu1 %v569_v55 }
 0x1a3   : > { %v523_v56 = vpop.f32.mrf.mxu2 }
 0x1a4   : > { %v1340_v57 = vadd.f32 %v1267_v13, %v523_v56  ;;  %v1342_v58 = vpop.xlane.xlu0 %531 }
 0x1a5   : > { %v578_v59 = vsub.f32 %v1270_v15, %v1342_v58 }
 0x1a6   : > { %v572_v60 = vsel %vm529_vm2, %v1340_v57, -inf }
 0x1a7   : > { %v594_v61 = vmul.f32 1.442695, %v578_v59  ;;  %573 = vmax.xlane.f32.xlu2 %v572_v60 }
 0x1a9   : > { %922 = vpow2.f32 %v594_v61 }
 0x1ab   : > { %v526_v62 = vpop.f32.mrf.mxu2 }
 0x1ac   : > { %v1349_v63 = vadd.f32 %v1267_v13, %v526_v62  ;;  %v1351_v0 = vpop.xlane.xlu0 %534 }
 0x1ad   : > { %v579_v1 = vsub.f32 %v1275_v18, %v1351_v0 }
 0x1ae   : > { %v575_v2 = vsel %vm529_vm2, %v1349_v63, -inf }
 0x1af   : > { %v923_v3 = vpop.eup %922  ;;  %v596_v4 = vmul.f32 1.442695, %v579_v1  ;;  %576 = vmax.xlane.f32.xlu0 %v575_v2 }
 0x1b0   : > { %v626_v5 = vsel %vm529_vm2, %v923_v3, 0.0 }
 0x1b1   : > { %924 = vpow2.f32 %v596_v4  ;;  %627 = vadd.xlane.f32.xlu1 %v626_v5 }
 0x1b4   : > { %v1358_v6 = vpop.xlane.xlu1 %537 }
 0x1b5   : > { %v580_v7 = vsub.f32 %v1280_v21, %v1358_v6 }
 0x1b7   : > { %v925_v8 = vpop.eup %924  ;;  %v598_v9 = vmul.f32 1.442695, %v580_v7 }
 0x1b8   : > { %v629_v10 = vsel %vm529_vm2, %v925_v8, 0.0 }
 0x1b9   : > { %926 = vpow2.f32 %v598_v9  ;;  %630 = vadd.xlane.f32.xlu2 %v629_v10 }
 0x1bc   : > { %v1363_v11 = vpop.xlane.xlu1 %540 }
 0x1bd   : > { %v581_v12 = vsub.f32 %v1285_v24, %v1363_v11 }
 0x1bf   : > { %v927_v13 = vpop.eup %926  ;;  %v600_v14 = vmul.f32 1.442695, %v581_v12 }
 0x1c0   : > { %v632_v16 = vsel %vm529_vm2, %v927_v13, 0.0 }
 0x1c1   : > { %928 = vpow2.f32 %v600_v14  ;;  %633 = vadd.xlane.f32.xlu0 %v632_v16 }
 0x1c4   : > { %v1368_v17 = vpop.xlane.xlu2 %543 }
 0x1c5   : > { %v582_v19 = vsub.f32 %v1290_v27, %v1368_v17 }
 0x1c7   : > { %v929_v20 = vpop.eup %928  ;;  %v602_v22 = vmul.f32 1.442695, %v582_v19 }
 0x1c8   : > { %v635_v23 = vsel %vm529_vm2, %v929_v20, 0.0 }
 0x1c9   : > { %930 = vpow2.f32 %v602_v22  ;;  %636 = vadd.xlane.f32.xlu1 %v635_v23 }
 0x1cc   : > { %v1373_v25 = vpop.xlane.xlu2 %546 }
 0x1cd   : > { %v583_v26 = vsub.f32 %v1295_v30, %v1373_v25 }
 0x1cf   : > { %v931_v28 = vpop.eup %930  ;;  %v604_v29 = vmul.f32 1.442695, %v583_v26 }
 0x1d0   : > { %v638_v31 = vsel %vm529_vm2, %v931_v28, 0.0 }
 0x1d1   : > { %932 = vpow2.f32 %v604_v29  ;;  %639 = vadd.xlane.f32.xlu2 %v638_v31 }
 0x1d4   : > { %v1378_v32 = vpop.xlane.xlu0 %549 }
 0x1d5   : > { %v584_v34 = vsub.f32 %v1300_v33, %v1378_v32 }
 0x1d7   : > { %v933_v35 = vpop.eup %932  ;;  %v606_v37 = vmul.f32 1.442695, %v584_v34 }
 0x1d8   : > { %v641_v38 = vsel %vm529_vm2, %v933_v35, 0.0 }
 0x1d9   : > { %934 = vpow2.f32 %v606_v37  ;;  %642 = vadd.xlane.f32.xlu0 %v641_v38 }
 0x1dc   : > { %v1383_v40 = vpop.xlane.xlu1 %552 }
 0x1dd   : > { %v585_v41 = vsub.f32 %v1305_v36, %v1383_v40 }
 0x1df   : > { %v935_v43 = vpop.eup %934  ;;  %v608_v44 = vmul.f32 1.442695, %v585_v41 }
 0x1e0   : > { %v644_v46 = vsel %vm529_vm2, %v935_v43, 0.0 }
 0x1e1   : > { %936 = vpow2.f32 %v608_v44  ;;  %645 = vadd.xlane.f32.xlu1 %v644_v46 }
 0x1e7   : > { %v937_v47 = vpop.eup %936 }
 0x1e8   : > { %v647_v49 = vsel %vm529_vm2, %v937_v47, 0.0 }
 0x1e9   : > { %648 = vadd.xlane.f32.xlu2 %v647_v49 }
 0x1ea   : > { %v1389_v50 = vpop.xlane.xlu2 %555 }
 0x1eb   : > { %v586_v52 = vsub.f32 %v1310_v39, %v1389_v50 }
 0x1ed   : > { %v610_v53 = vmul.f32 1.442695, %v586_v52 }
 0x1ef   : > { %938 = vpow2.f32 %v610_v53 }
 0x1f2   : > { %v1393_v55 = vpop.xlane.xlu0 %558 }
 0x1f3   : > { %v587_v56 = vsub.f32 %v1315_v42, %v1393_v55 }
 0x1f5   : > { %v939_v59 = vpop.eup %938  ;;  %v612_v60 = vmul.f32 1.442695, %v587_v56 }
 0x1f6   : > { %v650_v61 = vsel %vm529_vm2, %v939_v59, 0.0 }
 0x1f7   : > { %940 = vpow2.f32 %v612_v60  ;;  %651 = vadd.xlane.f32.xlu0 %v650_v61 }
 0x1fa   : > { %v1398_v62 = vpop.xlane.xlu1 %561 }
 0x1fb   : > { %v588_v1 = vsub.f32 %v1320_v45, %v1398_v62 }
 0x1fd   : > { %v941_v2 = vpop.eup %940  ;;  %v614_v3 = vmul.f32 1.442695, %v588_v1 }
 0x1fe   : > { %v653_v4 = vsel %vm529_vm2, %v941_v2, 0.0 }
 0x1ff   : > { %942 = vpow2.f32 %v614_v3  ;;  %654 = vadd.xlane.f32.xlu1 %v653_v4 }
 0x202   : > { %v1403_v5 = vpop.xlane.xlu2 %564 }
 0x203   : > { %v589_v7 = vsub.f32 %v1325_v48, %v1403_v5 }
 0x205   : > { %v943_v8 = vpop.eup %942  ;;  %v616_v9 = vmul.f32 1.442695, %v589_v7 }
 0x206   : > { %v656_v10 = vsel %vm529_vm2, %v943_v8, 0.0 }
 0x207   : > { %944 = vpow2.f32 %v616_v9  ;;  %657 = vadd.xlane.f32.xlu2 %v656_v10 }
 0x20a   : > { %v1408_v12 = vpop.xlane.xlu0 %567 }
 0x20b   : > { %v590_v13 = vsub.f32 %v1330_v51, %v1408_v12 }
 0x20d   : > { %v945_v14 = vpop.eup %944  ;;  %v618_v16 = vmul.f32 1.442695, %v590_v13 }
 0x20e   : > { %v659_v19 = vsel %vm529_vm2, %v945_v14, 0.0 }
 0x20f   : > { %946 = vpow2.f32 %v618_v16  ;;  %660 = vadd.xlane.f32.xlu0 %v659_v19 }
 0x212   : > { %v1413_v20 = vpop.xlane.xlu1 %570 }
 0x213   : > { %v591_v22 = vsub.f32 %v1335_v54, %v1413_v20 }
 0x215   : > { %v947_v23 = vpop.eup %946  ;;  %v620_v26 = vmul.f32 1.442695, %v591_v22 }
 0x216   : > { %v662_v28 = vsel %vm529_vm2, %v947_v23, 0.0 }
 0x217   : > { %948 = vpow2.f32 %v620_v26  ;;  %663 = vadd.xlane.f32.xlu1 %v662_v28 }
 0x21a   : > { %v1418_v29 = vpop.xlane.xlu2 %573 }
 0x21b   : > { %v592_v31 = vsub.f32 %v1340_v57, %v1418_v29 }
 0x21d   : > { %v949_v34 = vpop.eup %948  ;;  %v622_v35 = vmul.f32 1.442695, %v592_v31 }
 0x21e   : > { %v665_v37 = vsel %vm529_vm2, %v949_v34, 0.0 }
 0x21f   : > { %950 = vpow2.f32 %v622_v35  ;;  %666 = vadd.xlane.f32.xlu2 %v665_v37 }
 0x222   : > { %v1425_v38 = vpop.xlane.xlu0 %576 }
 0x223   : > { %v593_v41 = vsub.f32 %v1349_v63, %v1425_v38 }
 0x224   : > { %v628_v43 = vpop.xlane.xlu1 %627 }
 0x225   : > { %v951_v44 = vpop.eup %950  ;;  %v624_v46 = vmul.f32 1.442695, %v593_v41  ;;  %952 = vlog2.f32 %v628_v43 }
 0x226   : > { %v668_v47 = vsel %vm529_vm2, %v951_v44, 0.0 }
 0x227   : > { %954 = vpow2.f32 %v624_v46  ;;  %669 = vadd.xlane.f32.xlu0 %v668_v47 }
 0x22b   : > { %v953_v49 = vpop.eup %952 }
 0x22c   : > { %v675_v52 = vmul.f32 0.6931472, %v953_v49  ;;  %v631_v53 = vpop.xlane.xlu2 %630 }
 0x22d   : > { %v955_v56 = vpop.eup %954  ;;  %956 = vlog2.f32 %v631_v53 }
 0x22e   : > { %v706_v59 = vadd.f32 %v675_v52, %v1342_v58  ;;  %v671_v60 = vsel %vm529_vm2, %v955_v56, 0.0 }
 0x22f   : > { %672 = vadd.xlane.f32.xlu1 %v671_v60 }
 0x230   : > { %v722_v61 = vsub.f32 %v1270_v15, %v706_v59 }
 0x232   : > { %738 = vst.msk [vmem:[%s1435_s25] sm:$0xff] %vm529_vm2, %v722_v61 }
 0x233   : > { %v957_v1 = vpop.eup %956 }
 0x234   : > { %v677_v2 = vmul.f32 0.6931472, %v957_v1  ;;  %v634_v3 = vpop.xlane.xlu0 %633 }
 0x235   : > { %958 = vlog2.f32 %v634_v3 }
 0x236   : > { %v707_v58 = vadd.f32 %v677_v2, %v1351_v0 }
 0x238   : > { %v723_v4 = vsub.f32 %v1275_v18, %v707_v58 }
 0x23a   : > { %739 = vst.msk [vmem:[%s1435_s25 + $0x8] sm:$0xff] %vm529_vm2, %v723_v4 }
 0x23b   : > { %v959_v7 = vpop.eup %958 }
 0x23c   : > { %v679_v8 = vmul.f32 0.6931472, %v959_v7  ;;  %v637_v9 = vpop.xlane.xlu1 %636 }
 0x23d   : > { %960 = vlog2.f32 %v637_v9 }
 0x23e   : > { %v708_v10 = vadd.f32 %v679_v8, %v1358_v6 }
 0x240   : > { %v724_v15 = vsub.f32 %v1280_v21, %v708_v10 }
 0x242   : > { %740 = vst.msk [vmem:[%s1435_s25 + $0x10] sm:$0xff] %vm529_vm2, %v724_v15 }
 0x243   : > { %v961_v13 = vpop.eup %960 }
 0x244   : > { %v681_v14 = vmul.f32 0.6931472, %v961_v13  ;;  %v640_v16 = vpop.xlane.xlu2 %639 }
 0x245   : > { %962 = vlog2.f32 %v640_v16 }
 0x246   : > { %v709_v0 = vadd.f32 %v681_v14, %v1363_v11 }
 0x248   : > { %v725_v18 = vsub.f32 %v1285_v24, %v709_v0 }
 0x24a   : > { %741 = vst.msk [vmem:[%s1435_s25 + $0x18] sm:$0xff] %vm529_vm2, %v725_v18 }
 0x24b   : > { %v963_v19 = vpop.eup %962 }
 0x24c   : > { %v683_v22 = vmul.f32 0.6931472, %v963_v19  ;;  %v643_v23 = vpop.xlane.xlu0 %642 }
 0x24d   : > { %964 = vlog2.f32 %v643_v23 }
 0x24e   : > { %v710_v6 = vadd.f32 %v683_v22, %v1368_v17 }
 0x250   : > { %v726_v21 = vsub.f32 %v1290_v27, %v710_v6 }
 0x252   : > { %742 = vst.msk [vmem:[%s1435_s25 + $0x20] sm:$0xff] %vm529_vm2, %v726_v21 }
 0x253   : > { %v965_v26 = vpop.eup %964 }
 0x254   : > { %v685_v28 = vmul.f32 0.6931472, %v965_v26  ;;  %v646_v31 = vpop.xlane.xlu1 %645 }
 0x255   : > { %966 = vlog2.f32 %v646_v31 }
 0x256   : > { %v711_v24 = vadd.f32 %v685_v28, %v1373_v25 }
 0x258   : > { %v727_v11 = vsub.f32 %v1295_v30, %v711_v24 }
 0x25a   : > { %743 = vst.msk [vmem:[%s1435_s25 + $0x28] sm:$0xff] %vm529_vm2, %v727_v11 }
 0x25b   : > { %v967_v34 = vpop.eup %966 }
 0x25c   : > { %v687_v35 = vmul.f32 0.6931472, %v967_v34  ;;  %v649_v37 = vpop.xlane.xlu2 %648 }
 0x25d   : > { %968 = vlog2.f32 %v649_v37 }
 0x25e   : > { %v712_v17 = vadd.f32 %v687_v35, %v1378_v32 }
 0x260   : > { %v728_v27 = vsub.f32 %v1300_v33, %v712_v17 }
 0x262   : > { %744 = vst.msk [vmem:[%s1435_s25 + $0x30] sm:$0xff] %vm529_vm2, %v728_v27 }
 0x263   : > { %v969_v41 = vpop.eup %968 }
 0x264   : > { %v689_v43 = vmul.f32 0.6931472, %v969_v41 }
 0x266   : > { %v713_v44 = vadd.f32 %v689_v43, %v1383_v40 }
 0x268   : > { %v729_v25 = vsub.f32 %v1305_v36, %v713_v44 }
 0x26a   : > { %745 = vst.msk [vmem:[%s1435_s25 + $0x38] sm:$0xff] %vm529_vm2, %v729_v25  ;;  %v652_v30 = vpop.xlane.xlu0 %651 }
 0x26b   : > { %970 = vlog2.f32 %v652_v30 }
 0x271   : > { %v971_v46 = vpop.eup %970 }
 0x272   : > { %v691_v47 = vmul.f32 0.6931472, %v971_v46  ;;  %v655_v49 = vpop.xlane.xlu1 %654 }
 0x273   : > { %972 = vlog2.f32 %v655_v49 }
 0x274   : > { %v714_v32 = vadd.f32 %v691_v47, %v1389_v50 }
 0x276   : > { %v730_v33 = vsub.f32 %v1310_v39, %v714_v32 }
 0x278   : > { %746 = vst.msk [vmem:[%s1435_s25 + $0x40] sm:$0xff] %vm529_vm2, %v730_v33 }
 0x279   : > { %v973_v52 = vpop.eup %972 }
 0x27a   : > { %v693_v40 = vmul.f32 0.6931472, %v973_v52  ;;  %v658_v53 = vpop.xlane.xlu2 %657 }
 0x27b   : > { %974 = vlog2.f32 %v658_v53 }
 0x27c   : > { %v715_v36 = vadd.f32 %v693_v40, %v1393_v55 }
 0x27e   : > { %v731_v56 = vsub.f32 %v1315_v42, %v715_v36 }
 0x280   : > { %747 = vst.msk [vmem:[%s1435_s25 + $0x48] sm:$0xff] %vm529_vm2, %v731_v56 }
 0x281   : > { %v975_v59 = vpop.eup %974 }
 0x282   : > { %v695_v60 = vmul.f32 0.6931472, %v975_v59  ;;  %v661_v61 = vpop.xlane.xlu0 %660 }
 0x283   : > { %976 = vlog2.f32 %v661_v61 }
 0x284   : > { %v716_v50 = vadd.f32 %v695_v60, %v1398_v62 }
 0x286   : > { %v732_v39 = vsub.f32 %v1320_v45, %v716_v50 }
 0x288   : > { %748 = vst.msk [vmem:[%s1435_s25 + $0x50] sm:$0xff] %vm529_vm2, %v732_v39 }
 0x289   : > { %v977_v1 = vpop.eup %976 }
 0x28a   : > { %v697_v2 = vmul.f32 0.6931472, %v977_v1  ;;  %v664_v3 = vpop.xlane.xlu1 %663 }
 0x28b   : > { %978 = vlog2.f32 %v664_v3 }
 0x28c   : > { %v717_v55 = vadd.f32 %v697_v2, %v1403_v5 }
 0x28e   : > { %v733_v42 = vsub.f32 %v1325_v48, %v717_v55 }
 0x290   : > { %749 = vst.msk [vmem:[%s1435_s25 + $0x58] sm:$0xff] %vm529_vm2, %v733_v42 }
 0x291   : > { %v979_v58 = vpop.eup %978 }
 0x292   : > { %v699_v4 = vmul.f32 0.6931472, %v979_v58  ;;  %v667_v7 = vpop.xlane.xlu2 %666 }
 0x293   : > { %980 = vlog2.f32 %v667_v7 }
 0x294   : > { %v718_v62 = vadd.f32 %v699_v4, %v1408_v12 }
 0x296   : > { %v734_v45 = vsub.f32 %v1330_v51, %v718_v62 }
 0x298   : > { %750 = vst.msk [vmem:[%s1435_s25 + $0x60] sm:$0xff] %vm529_vm2, %v734_v45 }
 0x299   : > { %v981_v8 = vpop.eup %980 }
 0x29a   : > { %v701_v9 = vmul.f32 0.6931472, %v981_v8  ;;  %v670_v10 = vpop.xlane.xlu0 %669 }
 0x29b   : > { %982 = vlog2.f32 %v670_v10 }
 0x29c   : > { %v719_v48 = vadd.f32 %v701_v9, %v1413_v20 }
 0x29e   : > { %v735_v5 = vsub.f32 %v1335_v54, %v719_v48 }
 0x2a0   : > { %751 = vst.msk [vmem:[%s1435_s25 + $0x68] sm:$0xff] %vm529_vm2, %v735_v5 }
 0x2a1   : > { %v983_v15 = vpop.eup %982 }
 0x2a2   : > { %v703_v13 = vmul.f32 0.6931472, %v983_v15  ;;  %v673_v14 = vpop.xlane.xlu1 %672 }
 0x2a3   : > { %984 = vlog2.f32 %v673_v14 }
 0x2a4   : > { %v720_v12 = vadd.f32 %v703_v13, %v1418_v29 }
 0x2a6   : > { %v736_v51 = vsub.f32 %v1340_v57, %v720_v12 }
 0x2a8   : > { %752 = vst.msk [vmem:[%s1435_s25 + $0x70] sm:$0xff] %vm529_vm2, %v736_v51 }
 0x2a9   : > { %v985_v16 = vpop.eup %984 }
 0x2aa   : > { %v705_v0 = vmul.f32 0.6931472, %v985_v16 }
 0x2ac   : > { %v721_v18 = vadd.f32 %v705_v0, %v1425_v38 }
 0x2ae   : > { %v737_v20 = vsub.f32 %v1349_v63, %v721_v18 }
 0x2b0   : > { %753 = vst.msk [vmem:[%s1435_s25 + $0x78] sm:$0xff] %vm529_vm2, %v737_v20 }
 0x2b1 PF: > { %p15_p7 = scmp.ge.s32.totalorder %s1104_s23, 4   ;;  %s1522_s18 = smov %s1042_s19 }
 0x2b2   : > { %s1523_s19 = smov %s1046_s20  ;;  %s1524_s20 = smov %s1114_s26 }
 0x2b3   : > { %s1525_s21 = smov %s1104_s23  ;;  %17 = sbr.rel (!%p15_p7) target bundleno = 3 (0x3), region = 80 }
 0x2b8   :  { %776 = vsyncpa [#allocation3], 1 }
 0x2b9   :  { %778 = vsyncpa [#allocation3 + $0x1], 1 }

</bundles_post_ra>
